<compile_context>
chip_gen: v5e
topology: v5e:2x2
jax: 0.10.0
libtpu: 0.0.40
codegen_flags: <defaults>
</compile_context>

<pallas_src>
import functools

import jax
import jax.numpy as jnp
from jax.experimental import pallas as pl
from jax.experimental.pallas import tpu as pltpu

_LANE = 128
_SUBLANE = 8
_MAX_TILED_TM = 1024          # fallback path: M//tm ~ 1 -> weights streamed once


def _round_up(x: int, m: int) -> int:
    return ((x + m - 1) // m) * m


def _vmem_capacity_bytes() -> int:
    """Per-TensorCore VMEM capacity (v7x: 64 MiB/TC, v5e/v6e: 128 MiB)."""
    try:
        cap = int(pltpu.get_tpu_info().vmem_capacity_bytes)
        if cap > 0:
            return cap
    except Exception:
        pass
    return 64 * 1024 * 1024   # conservative default (v7x per-TC)


def _vmem_budget_bytes(cap: int) -> int:
    # ~48 MiB on a 64 MiB part, ~96 MiB on a 128 MiB part; leave headroom for
    # compiler scratch/spills.  Budget is per-TensorCore: with the batch grid
    # axis marked "parallel", each v7x TC holds its own resident weight copy.
    return max(min((3 * cap) // 4, cap - 16 * 1024 * 1024), 24 * 1024 * 1024)


def _is_v5e() -> bool:
    try:
        kind = jax.devices()[0].device_kind.lower()
        return ("v5 lite" in kind) or ("v5e" in kind) or ("v5litepod" in kind)
    except Exception:
        return False


_VMEM_CAP = _vmem_capacity_bytes()
_VMEM_BUDGET = _vmem_budget_bytes(_VMEM_CAP)
_IS_V5E = _is_v5e()


def _spec(block_shape, index_map, buffer_count=None):
    """BlockSpec, optionally with an explicit pipeline buffer count."""
    if buffer_count is not None and hasattr(pl, "Buffered"):
        try:
            return pl.BlockSpec(block_shape, index_map,
                                pipeline_mode=pl.Buffered(buffer_count))
        except TypeError:       # older jax without pipeline_mode kwarg
            pass
    return pl.BlockSpec(block_shape, index_map)


# ---------------------------------------------------------------------------
# Path 1: fully fused MLP — one kernel, activations never leave VMEM/vregs
# ---------------------------------------------------------------------------

def _mlp_fused_kernel(*refs, n_layers: int):
    """refs = (x, w0, b0, w1, b1, ..., w_{L-1}, b_{L-1}, out).  x/w/b are bf16."""
    x_ref = refs[0]
    o_ref = refs[-1]
    h = x_ref[...]                                   # bf16 into the MXU
    for i in range(n_layers):
        w = refs[1 + 2 * i][...]                     # bf16
        b = refs[2 + 2 * i][...]                     # bf16 (1, dout)
        acc = jnp.dot(h, w, preferred_element_type=jnp.float32)
        acc = acc + b.astype(jnp.float32)            # bias add on the f32 acc
        if i != n_layers - 1:                        # hidden layers: ReLU
            acc = jnp.maximum(acc, 0.0)
            h = acc.astype(jnp.bfloat16)             # bf16 operand for next dot
        else:
            o_ref[...] = acc.astype(o_ref.dtype)


def mlp_fused_forward(x_pad, weights_pad, biases_pad, *, tile_m: int,
                      vmem_limit: int, use_buffer_hints: bool):
    """x_pad: (Mp, d0p) bf16; weights_pad[i]: (d_ip, d_{i+1}p) bf16; biases (1, d)."""
    m_pad, d0 = x_pad.shape
    d_last = weights_pad[-1].shape[1]
    n_layers = len(weights_pad)
    assert m_pad % tile_m == 0

    param_bufs = 1 if use_buffer_hints else None     # resident -> single-buffer
    in_specs = [pl.BlockSpec((tile_m, d0), lambda i: (i, 0))]
    args = [x_pad]
    for w, b in zip(weights_pad, biases_pad):
        din, dout = w.shape
        # Constant block index -> weight/bias tiles stay resident across all
        # batch-tile grid steps (no re-DMA per step).
        in_specs.append(_spec((din, dout), lambda i: (0, 0), param_bufs))
        in_specs.append(_spec((1, dout), lambda i: (0, 0), param_bufs))
        args += [w, b]

    kernel = functools.partial(_mlp_fused_kernel, n_layers=n_layers)
    return pl.pallas_call(
        kernel,
        out_shape=jax.ShapeDtypeStruct((m_pad, d_last), jnp.float32),
        grid=(m_pad // tile_m,),
        in_specs=in_specs,
        out_specs=pl.BlockSpec((tile_m, d_last), lambda i: (i, 0)),
        compiler_params=pltpu.CompilerParams(
            dimension_semantics=("parallel",),
            vmem_limit_bytes=int(vmem_limit),
        ),
    )(*args)


# ---------------------------------------------------------------------------
# Path 2: per-layer tiled matmul (fallback for parameters too big for VMEM)
# ---------------------------------------------------------------------------

def _linear_tiled_kernel(x_ref, w_ref, b_ref, o_ref, acc_ref, *, apply_relu: bool):
    k = pl.program_id(2)

    @pl.when(k == 0)
    def _():
        # Fold the bias into the accumulator init -> one less VPU add + one less
        # broadcast on the finalize (epilogue) path.
        acc_ref[...] = jnp.broadcast_to(b_ref[...].astype(jnp.float32),
                                        acc_ref.shape)

    acc_ref[...] += jnp.dot(x_ref[...], w_ref[...],
                            preferred_element_type=jnp.float32)

    @pl.when(k == pl.num_programs(2) - 1)
    def _():
        y = acc_ref[...]
        if apply_relu:
            y = jnp.maximum(y, 0.0)
        o_ref[...] = y.astype(o_ref.dtype)


def pallas_linear_tiled(x, w, b, *, apply_relu: bool, tm: int, tn: int, tk: int,
                        out_dtype, use_buffer_hints: bool):
    """x: (M, K) bf16, w: (K, N) bf16, b: (1, N) bf16; dims padded to tiles."""
    m, k_dim = x.shape
    k2, n = w.shape
    assert k_dim == k2 and m % tm == 0 and n % tn == 0 and k_dim % tk == 0
    # Deeper weight-stream pipeline hides the per-K-step DMA when tm is small.
    w_bufs = 3 if use_buffer_hints else None
    return pl.pallas_call(
        functools.partial(_linear_tiled_kernel, apply_relu=apply_relu),
        out_shape=jax.ShapeDtypeStruct((m, n), out_dtype),
        grid=(m // tm, n // tn, k_dim // tk),            # reduction axis last
        in_specs=[
            pl.BlockSpec((tm, tk), lambda i, j, kk: (i, kk)),
            _spec((tk, tn), lambda i, j, kk: (kk, j), w_bufs),
            pl.BlockSpec((1, tn), lambda i, j, kk: (0, j)),   # bias: no K dep
        ],
        out_specs=pl.BlockSpec((tm, tn), lambda i, j, kk: (i, j)),
        scratch_shapes=[pltpu.VMEM((tm, tn), jnp.float32)],
        compiler_params=pltpu.CompilerParams(
            dimension_semantics=("parallel", "parallel", "arbitrary")),
    )(x, w, b)


# ---------------------------------------------------------------------------
# Module wrapper
# ---------------------------------------------------------------------------

class PallasMLP:
    """JAX/Pallas equivalent of the PyTorch MLP module (inference semantics)."""

    def __init__(self, dims, *, squeeze_output: bool = False, dropout=None,
                 key=None, force_tiled: bool = False):
        if len(dims) < 2:
            raise ValueError("MLP requires at least two dims (input and output)")
        if squeeze_output and dims[-1] != 1:
            raise ValueError("Last dim must be 1 when squeezing")
        self.dims = list(dims)
        self.squeeze_output = squeeze_output
        # TODO(synk): dropout is a no-op here (eval-mode semantics); training-mode
        # dropout needs pltpu.prng_seed/prng_random_bits inside the kernel.
        self.dropout = dropout
        # TODO(synk): output_activation_fn (default None in the spec) not plumbed.

        if key is None:
            key = jax.random.PRNGKey(0)
        # nn.Linear default init: U(-1/sqrt(fan_in), 1/sqrt(fan_in)).
        # Weights kept pre-transposed (in, out); bias kept as (1, out).
        self.weights, self.biases = [], []
        for i in range(len(dims) - 1):
            key, wk, bk = jax.random.split(key, 3)
            fan_in, fan_out = dims[i], dims[i + 1]
            bound = 1.0 / float(fan_in) ** 0.5
            self.weights.append(
                jax.random.uniform(wk, (fan_in, fan_out), jnp.float32, -bound, bound))
            self.biases.append(
                jax.random.uniform(bk, (1, fan_out), jnp.float32, -bound, bound))

        self._vmem_cap = _VMEM_CAP
        self._budget = _VMEM_BUDGET
        self._buffer_hints = hasattr(pl, "Buffered")

        # ---- fused-path parameters: 128-padded, bf16, padded with zeros ----
        n_layers = len(dims) - 1
        self.dims_pad_fused = [_round_up(d, _LANE) for d in dims]
        self.weights_fused, self.biases_fused = [], []
        for i in range(n_layers):
            di, do = dims[i], dims[i + 1]
            dip, dop = self.dims_pad_fused[i], self.dims_pad_fused[i + 1]
            self.weights_fused.append(
                jnp.pad(self.weights[i], ((0, dip - di), (0, dop - do)))
                .astype(jnp.bfloat16))
            self.biases_fused.append(
                jnp.pad(self.biases[i], ((0, 0), (0, dop - do)))
                .astype(jnp.bfloat16))

        self.use_fused = (not force_tiled) and (
            self._fused_vmem_estimate(tile_m=8) <= self._budget)

        self._tiled_ready = False   # tiled-path params built lazily if needed

    # ---- fused path -----------------------------------------------------
    def _fused_vmem_estimate(self, tile_m: int) -> int:
        param_buffers = 1 if self._buffer_hints else 2
        wbytes = 2 * sum(w.size + b.size
                         for w, b in zip(self.weights_fused, self.biases_fused))
        d0p, dlp = self.dims_pad_fused[0], self.dims_pad_fused[-1]
        maxd = max(self.dims_pad_fused)
        io = 2 * tile_m * (2 * d0p + 4 * dlp)     # double-buffered bf16 in / f32 out
        live = tile_m * maxd * 6                  # f32 acc + bf16 h live in VMEM/vregs
        return param_buffers * wbytes + io + live + (2 << 20)

    def _pick_fused_tile_m(self, batch: int) -> int:
        m8 = _round_up(batch, _SUBLANE)
        cap_tile = 512 if self._vmem_cap <= 64 * 1024 * 1024 else 1024
        if m8 <= cap_tile and self._fused_vmem_estimate(m8) <= self._budget:
            return m8
        for t in (cap_tile, 512, 256, 128, 64, 32, 16, 8):
            if t <= cap_tile and self._fused_vmem_estimate(t) <= self._budget:
                return t
        return 8

    def _forward_fused(self, x, batch):
        tile_m = self._pick_fused_tile_m(batch)
        m_pad = _round_up(batch, tile_m)
        d0p = self.dims_pad_fused[0]
        x_pad = jnp.pad(x.astype(jnp.bfloat16),
                        ((0, m_pad - batch), (0, d0p - x.shape[1])))
        kwargs = dict(tile_m=tile_m, vmem_limit=self._budget)
        if self._buffer_hints:
            try:
                return mlp_fused_forward(x_pad, self.weights_fused,
                                         self.biases_fused,
                                         use_buffer_hints=True, **kwargs)
            except Exception:
                self._buffer_hints = False
        return mlp_fused_forward(x_pad, self.weights_fused, self.biases_fused,
                                 use_buffer_hints=False, **kwargs)

    # ---- tiled fallback path --------------------------------------------
    def _ensure_tiled_params(self):
        if self._tiled_ready:
            return
        # v5e MXU is 128x128 -> 128 tiles; 256 tiles only on v6e/v7x and only
        # when the true dim supports it (avoid padding e.g. 48 -> 256).
        def feat(d):
            return 128 if (_IS_V5E or d < 256) else 256
        self._tiled_feat = [feat(d) for d in self.dims]
        self.dims_pad_tiled = [_round_up(d, f)
                               for d, f in zip(self.dims, self._tiled_feat)]
        self.weights_tiled, self.biases_tiled = [], []
        for i in range(len(self.dims) - 1):
            di, do = self.dims[i], self.dims[i + 1]
            dip, dop = self.dims_pad_tiled[i], self.dims_pad_tiled[i + 1]
            self.weights_tiled.append(
                jnp.pad(self.weights[i], ((0, dip - di), (0, dop - do)))
                .astype(jnp.bfloat16))
            self.biases_tiled.append(
                jnp.pad(self.biases[i], ((0, 0), (0, dop - do)))
                .astype(jnp.bfloat16))
        self._tiled_ready = True

    def _forward_tiled(self, x, batch):
        self._ensure_tiled_params()
        m8 = _round_up(batch, _SUBLANE)
        tm = min(_MAX_TILED_TM, m8)                 # M//tm ~ 1 -> weights read once
        m_pad = _round_up(batch, tm)
        h = jnp.pad(x.astype(jnp.bfloat16),
                    ((0, m_pad - batch), (0, self.dims_pad_tiled[0] - x.shape[1])))
        n_layers = len(self.weights_tiled)
        # TODO(synk): consecutive layers could be fused into one pallas_call with
        # pltpu.emit_pipeline over K to remove inter-layer HBM round-trips.
        for i in range(n_layers):
            is_last = i == n_layers - 1
            kwargs = dict(apply_relu=not is_last, tm=tm,
                          tk=self._tiled_feat[i], tn=self._tiled_feat[i + 1],
                          out_dtype=jnp.float32 if is_last else jnp.bfloat16)
            if self._buffer_hints:
                try:
                    h = pallas_linear_tiled(h, self.weights_tiled[i],
                                            self.biases_tiled[i],
                                            use_buffer_hints=True, **kwargs)
                    continue
                except Exception:
                    self._buffer_hints = False
            h = pallas_linear_tiled(h, self.weights_tiled[i], self.biases_tiled[i],
                                    use_buffer_hints=False, **kwargs)
        return h

    # ---- public API -------------------------------------------------------
    def __call__(self, x):
        batch, in_f = x.shape
        assert in_f == self.dims[0], (in_f, self.dims[0])
        y = None
        if self.use_fused:
            try:
                y = self._forward_fused(x, batch)
            except Exception:
                # e.g. scoped-VMEM overflow on this generation -> tiled fallback.
                self.use_fused = False
        if y is None:
            y = self._forward_tiled(x, batch)
        y = y[:batch, :self.dims[-1]].astype(jnp.float32)
        if self.squeeze_output:
            y = jnp.squeeze(y, axis=-1)
        return y

    # pure-JAX reference (f32 master weights) for correctness checking
    def reference(self, x):
        h = x
        n_layers = len(self.weights)
        for i in range(n_layers):
            h = h @ self.weights[i] + self.biases[i]
            if i != n_layers - 1:
                h = jnp.maximum(h, 0.0)
        if self.squeeze_output:
            h = jnp.squeeze(h, axis=-1)
        return h


if __name__ == "__main__":
    key = jax.random.PRNGKey(0)
    xkey, pkey, x2key, p2key = jax.random.split(key, 4)

    # Config implied by the module: dims = [16, 32, 32, 1], squeeze_output=True
    # -> input (batch=8, 16), output (8,).  Exercises the fused single-kernel path.
    dims = [16, 32, 32, 1]
    batch = 8
    x = jax.random.normal(xkey, (batch, dims[0]), jnp.float32)

    mlp = PallasMLP(dims, squeeze_output=True, key=pkey)
    out = jax.block_until_ready(mlp(x))
    ref = mlp.reference(x)
    assert out.shape == (batch,), out.shape
    # bf16 operands (f32 accumulation) -> tolerance loosened vs the f32 reference.
    assert jnp.allclose(out, ref, atol=5e-2, rtol=5e-2), (out, ref)

    # Also exercise the tiled per-layer fallback path on small shapes.
    dims2 = [64, 96, 48]
    batch2 = 40
    x2 = jax.random.normal(x2key, (batch2, dims2[0]), jnp.float32)
    mlp2 = PallasMLP(dims2, key=p2key, force_tiled=True)
    out2 = jax.block_until_ready(mlp2(x2))
    ref2 = mlp2.reference(x2)
    assert out2.shape == (batch2, dims2[-1]), out2.shape
    assert jnp.allclose(out2, ref2, atol=5e-2, rtol=5e-2), (out2, ref2)

    print("KERNEL_OK")
</pallas_src>

<mosaic_0001>
module attributes {stable_mosaic.version = 11 : i64} {
  func.func @_mlp_fused_kernel(%arg0: i32, %arg1: memref<8x128xbf16, #tpu.memory_space<vmem>>, %arg2: memref<128x128xbf16, #tpu.memory_space<vmem>>, %arg3: memref<1x128xbf16, #tpu.memory_space<vmem>>, %arg4: memref<128x128xbf16, #tpu.memory_space<vmem>>, %arg5: memref<1x128xbf16, #tpu.memory_space<vmem>>, %arg6: memref<128x128xbf16, #tpu.memory_space<vmem>>, %arg7: memref<1x128xbf16, #tpu.memory_space<vmem>>, %arg8: memref<8x128xf32, #tpu.memory_space<vmem>>) attributes {dimension_semantics = [#tpu.dimension_semantics<parallel>], iteration_bounds = array<i64: 1>, scalar_prefetch = 0 : i64, scratch_operands = 0 : i64, tpu.core_type = #tpu.core_type<tc>, window_params = [{transform_indices = @transform_0, window_bounds = array<i64: 8, 128>}, {pipeline_mode = #tpu.pipeline_mode<synchronous>, transform_indices = @transform_1, window_bounds = array<i64: 128, 128>}, {pipeline_mode = #tpu.pipeline_mode<synchronous>, transform_indices = @transform_2, window_bounds = array<i64: 1, 128>}, {pipeline_mode = #tpu.pipeline_mode<synchronous>, transform_indices = @transform_3, window_bounds = array<i64: 128, 128>}, {pipeline_mode = #tpu.pipeline_mode<synchronous>, transform_indices = @transform_4, window_bounds = array<i64: 1, 128>}, {pipeline_mode = #tpu.pipeline_mode<synchronous>, transform_indices = @transform_5, window_bounds = array<i64: 128, 128>}, {pipeline_mode = #tpu.pipeline_mode<synchronous>, transform_indices = @transform_6, window_bounds = array<i64: 1, 128>}, {transform_indices = @transform_7, window_bounds = array<i64: 8, 128>}]} {
    %c0 = arith.constant 0 : index
    %c0_0 = arith.constant 0 : index
    %0 = vector.load %arg1[%c0, %c0_0] : memref<8x128xbf16, #tpu.memory_space<vmem>>, vector<8x128xbf16>
    %c0_1 = arith.constant 0 : index
    %c0_2 = arith.constant 0 : index
    %1 = vector.load %arg2[%c0_1, %c0_2] : memref<128x128xbf16, #tpu.memory_space<vmem>>, vector<128x128xbf16>
    %c0_3 = arith.constant 0 : index
    %c0_4 = arith.constant 0 : index
    %2 = vector.load %arg3[%c0_3, %c0_4] : memref<1x128xbf16, #tpu.memory_space<vmem>>, vector<1x128xbf16>
    %cst = arith.constant dense<0.000000e+00> : vector<8x128xf32>
    %3 = tpu.matmul %0, %1, %cst {dimension_numbers = #tpu.dot_dimension_numbers<[1], [0], [0], [1], [0, 0, 1, 1], [], []>} : vector<8x128xbf16>, vector<128x128xbf16>, vector<8x128xf32> -> vector<8x128xf32>
    %4 = arith.extf %2 : vector<1x128xbf16> to vector<1x128xf32>
    %5 = vector.broadcast %4 : vector<1x128xf32> to vector<8x128xf32>
    %6 = arith.addf %3, %5 : vector<8x128xf32>
    %cst_5 = arith.constant 0.000000e+00 : f32
    %7 = vector.broadcast %cst_5 : f32 to vector<8x128xf32>
    %8 = arith.maximumf %6, %7 : vector<8x128xf32>
    %9 = arith.truncf %8 : vector<8x128xf32> to vector<8x128xbf16>
    %c0_6 = arith.constant 0 : index
    %c0_7 = arith.constant 0 : index
    %10 = vector.load %arg4[%c0_6, %c0_7] : memref<128x128xbf16, #tpu.memory_space<vmem>>, vector<128x128xbf16>
    %c0_8 = arith.constant 0 : index
    %c0_9 = arith.constant 0 : index
    %11 = vector.load %arg5[%c0_8, %c0_9] : memref<1x128xbf16, #tpu.memory_space<vmem>>, vector<1x128xbf16>
    %cst_10 = arith.constant dense<0.000000e+00> : vector<8x128xf32>
    %12 = tpu.matmul %9, %10, %cst_10 {dimension_numbers = #tpu.dot_dimension_numbers<[1], [0], [0], [1], [0, 0, 1, 1], [], []>} : vector<8x128xbf16>, vector<128x128xbf16>, vector<8x128xf32> -> vector<8x128xf32>
    %13 = arith.extf %11 : vector<1x128xbf16> to vector<1x128xf32>
    %14 = vector.broadcast %13 : vector<1x128xf32> to vector<8x128xf32>
    %15 = arith.addf %12, %14 : vector<8x128xf32>
    %cst_11 = arith.constant 0.000000e+00 : f32
    %16 = vector.broadcast %cst_11 : f32 to vector<8x128xf32>
    %17 = arith.maximumf %15, %16 : vector<8x128xf32>
    %18 = arith.truncf %17 : vector<8x128xf32> to vector<8x128xbf16>
    %c0_12 = arith.constant 0 : index
    %c0_13 = arith.constant 0 : index
    %19 = vector.load %arg6[%c0_12, %c0_13] : memref<128x128xbf16, #tpu.memory_space<vmem>>, vector<128x128xbf16>
    %c0_14 = arith.constant 0 : index
    %c0_15 = arith.constant 0 : index
    %20 = vector.load %arg7[%c0_14, %c0_15] : memref<1x128xbf16, #tpu.memory_space<vmem>>, vector<1x128xbf16>
    %cst_16 = arith.constant dense<0.000000e+00> : vector<8x128xf32>
    %21 = tpu.matmul %18, %19, %cst_16 {dimension_numbers = #tpu.dot_dimension_numbers<[1], [0], [0], [1], [0, 0, 1, 1], [], []>} : vector<8x128xbf16>, vector<128x128xbf16>, vector<8x128xf32> -> vector<8x128xf32>
    %22 = arith.extf %20 : vector<1x128xbf16> to vector<1x128xf32>
    %23 = vector.broadcast %22 : vector<1x128xf32> to vector<8x128xf32>
    %24 = arith.addf %21, %23 : vector<8x128xf32>
    %c0_17 = arith.constant 0 : index
    %c0_18 = arith.constant 0 : index
    %25 = vector.load %arg8[%c0_17, %c0_18] : memref<8x128xf32, #tpu.memory_space<vmem>>, vector<8x128xf32>
    tpu.vector_store %arg8[%c0_17, %c0_18], %24 {strides = array<i32>} : memref<8x128xf32, #tpu.memory_space<vmem>>, vector<8x128xf32>,
    return
  }
  func.func @transform_0(%arg0: i32) -> (i32, i32) {
    %c0_i32 = arith.constant 0 : i32
    %c0_i32_0 = arith.constant 0 : i32
    return %arg0, %c0_i32 : i32, i32
  }
  func.func @transform_1(%arg0: i32) -> (i32, i32) {
    %c0_i32 = arith.constant 0 : i32
    %c0_i32_0 = arith.constant 0 : i32
    %c0_i32_1 = arith.constant 0 : i32
    return %c0_i32, %c0_i32_0 : i32, i32
  }
  func.func @transform_2(%arg0: i32) -> (i32, i32) {
    %c0_i32 = arith.constant 0 : i32
    %c0_i32_0 = arith.constant 0 : i32
    %c0_i32_1 = arith.constant 0 : i32
    return %c0_i32, %c0_i32_0 : i32, i32
  }
  func.func @transform_3(%arg0: i32) -> (i32, i32) {
    %c0_i32 = arith.constant 0 : i32
    %c0_i32_0 = arith.constant 0 : i32
    %c0_i32_1 = arith.constant 0 : i32
    return %c0_i32, %c0_i32_0 : i32, i32
  }
  func.func @transform_4(%arg0: i32) -> (i32, i32) {
    %c0_i32 = arith.constant 0 : i32
    %c0_i32_0 = arith.constant 0 : i32
    %c0_i32_1 = arith.constant 0 : i32
    return %c0_i32, %c0_i32_0 : i32, i32
  }
  func.func @transform_5(%arg0: i32) -> (i32, i32) {
    %c0_i32 = arith.constant 0 : i32
    %c0_i32_0 = arith.constant 0 : i32
    %c0_i32_1 = arith.constant 0 : i32
    return %c0_i32, %c0_i32_0 : i32, i32
  }
  func.func @transform_6(%arg0: i32) -> (i32, i32) {
    %c0_i32 = arith.constant 0 : i32
    %c0_i32_0 = arith.constant 0 : i32
    %c0_i32_1 = arith.constant 0 : i32
    return %c0_i32, %c0_i32_0 : i32, i32
  }
  func.func @transform_7(%arg0: i32) -> (i32, i32) {
    %c0_i32 = arith.constant 0 : i32
    %c0_i32_0 = arith.constant 0 : i32
    return %arg0, %c0_i32 : i32, i32
  }
}

module attributes {stable_mosaic.version = 11 : i64} {
  func.func @_mlp_fused_kernel(%arg0: i32, %arg1: memref<8x128xbf16, #tpu.memory_space<vmem>>, %arg2: memref<128x128xbf16, #tpu.memory_space<vmem>>, %arg3: memref<1x128xbf16, #tpu.memory_space<vmem>>, %arg4: memref<128x128xbf16, #tpu.memory_space<vmem>>, %arg5: memref<1x128xbf16, #tpu.memory_space<vmem>>, %arg6: memref<128x128xbf16, #tpu.memory_space<vmem>>, %arg7: memref<1x128xbf16, #tpu.memory_space<vmem>>, %arg8: memref<8x128xf32, #tpu.memory_space<vmem>>) attributes {dimension_semantics = [#tpu.dimension_semantics<parallel>], iteration_bounds = array<i64: 1>, scalar_prefetch = 0 : i64, scratch_operands = 0 : i64, tpu.core_type = #tpu.core_type<tc>, window_params = [{transform_indices = @transform_0, window_bounds = array<i64: 8, 128>}, {pipeline_mode = #tpu.pipeline_mode<synchronous>, transform_indices = @transform_1, window_bounds = array<i64: 128, 128>}, {pipeline_mode = #tpu.pipeline_mode<synchronous>, transform_indices = @transform_2, window_bounds = array<i64: 1, 128>}, {pipeline_mode = #tpu.pipeline_mode<synchronous>, transform_indices = @transform_3, window_bounds = array<i64: 128, 128>}, {pipeline_mode = #tpu.pipeline_mode<synchronous>, transform_indices = @transform_4, window_bounds = array<i64: 1, 128>}, {pipeline_mode = #tpu.pipeline_mode<synchronous>, transform_indices = @transform_5, window_bounds = array<i64: 128, 128>}, {pipeline_mode = #tpu.pipeline_mode<synchronous>, transform_indices = @transform_6, window_bounds = array<i64: 1, 128>}, {transform_indices = @transform_7, window_bounds = array<i64: 8, 128>}]} {
    %c0 = arith.constant 0 : index
    %c0_0 = arith.constant 0 : index
    %0 = vector.load %arg1[%c0, %c0_0] : memref<8x128xbf16, #tpu.memory_space<vmem>>, vector<8x128xbf16>
    %c0_1 = arith.constant 0 : index
    %c0_2 = arith.constant 0 : index
    %1 = vector.load %arg2[%c0_1, %c0_2] : memref<128x128xbf16, #tpu.memory_space<vmem>>, vector<128x128xbf16>
    %c0_3 = arith.constant 0 : index
    %c0_4 = arith.constant 0 : index
    %2 = vector.load %arg3[%c0_3, %c0_4] : memref<1x128xbf16, #tpu.memory_space<vmem>>, vector<1x128xbf16>
    %cst = arith.constant dense<0.000000e+00> : vector<8x128xf32>
    %3 = tpu.matmul %0, %1, %cst {dimension_numbers = #tpu.dot_dimension_numbers<[1], [0], [0], [1], [0, 0, 1, 1], [], []>} : vector<8x128xbf16>, vector<128x128xbf16>, vector<8x128xf32> -> vector<8x128xf32>
    %4 = arith.extf %2 : vector<1x128xbf16> to vector<1x128xf32>
    %5 = vector.broadcast %4 : vector<1x128xf32> to vector<8x128xf32>
    %6 = arith.addf %3, %5 : vector<8x128xf32>
    %cst_5 = arith.constant 0.000000e+00 : f32
    %7 = vector.broadcast %cst_5 : f32 to vector<8x128xf32>
    %8 = arith.maximumf %6, %7 : vector<8x128xf32>
    %9 = arith.truncf %8 : vector<8x128xf32> to vector<8x128xbf16>
    %c0_6 = arith.constant 0 : index
    %c0_7 = arith.constant 0 : index
    %10 = vector.load %arg4[%c0_6, %c0_7] : memref<128x128xbf16, #tpu.memory_space<vmem>>, vector<128x128xbf16>
    %c0_8 = arith.constant 0 : index
    %c0_9 = arith.constant 0 : index
    %11 = vector.load %arg5[%c0_8, %c0_9] : memref<1x128xbf16, #tpu.memory_space<vmem>>, vector<1x128xbf16>
    %cst_10 = arith.constant dense<0.000000e+00> : vector<8x128xf32>
    %12 = tpu.matmul %9, %10, %cst_10 {dimension_numbers = #tpu.dot_dimension_numbers<[1], [0], [0], [1], [0, 0, 1, 1], [], []>} : vector<8x128xbf16>, vector<128x128xbf16>, vector<8x128xf32> -> vector<8x128xf32>
    %13 = arith.extf %11 : vector<1x128xbf16> to vector<1x128xf32>
    %14 = vector.broadcast %13 : vector<1x128xf32> to vector<8x128xf32>
    %15 = arith.addf %12, %14 : vector<8x128xf32>
    %cst_11 = arith.constant 0.000000e+00 : f32
    %16 = vector.broadcast %cst_11 : f32 to vector<8x128xf32>
    %17 = arith.maximumf %15, %16 : vector<8x128xf32>
    %18 = arith.truncf %17 : vector<8x128xf32> to vector<8x128xbf16>
    %c0_12 = arith.constant 0 : index
    %c0_13 = arith.constant 0 : index
    %19 = vector.load %arg6[%c0_12, %c0_13] : memref<128x128xbf16, #tpu.memory_space<vmem>>, vector<128x128xbf16>
    %c0_14 = arith.constant 0 : index
    %c0_15 = arith.constant 0 : index
    %20 = vector.load %arg7[%c0_14, %c0_15] : memref<1x128xbf16, #tpu.memory_space<vmem>>, vector<1x128xbf16>
    %cst_16 = arith.constant dense<0.000000e+00> : vector<8x128xf32>
    %21 = tpu.matmul %18, %19, %cst_16 {dimension_numbers = #tpu.dot_dimension_numbers<[1], [0], [0], [1], [0, 0, 1, 1], [], []>} : vector<8x128xbf16>, vector<128x128xbf16>, vector<8x128xf32> -> vector<8x128xf32>
    %22 = arith.extf %20 : vector<1x128xbf16> to vector<1x128xf32>
    %23 = vector.broadcast %22 : vector<1x128xf32> to vector<8x128xf32>
    %24 = arith.addf %21, %23 : vector<8x128xf32>
    %c0_17 = arith.constant 0 : index
    %c0_18 = arith.constant 0 : index
    %25 = vector.load %arg8[%c0_17, %c0_18] : memref<8x128xf32, #tpu.memory_space<vmem>>, vector<8x128xf32>
    tpu.vector_store %arg8[%c0_17, %c0_18], %24 {strides = array<i32>} : memref<8x128xf32, #tpu.memory_space<vmem>>, vector<8x128xf32>,
    return
  }
  func.func @transform_0(%arg0: i32) -> (i32, i32) {
    %c0_i32 = arith.constant 0 : i32
    %c0_i32_0 = arith.constant 0 : i32
    return %arg0, %c0_i32 : i32, i32
  }
  func.func @transform_1(%arg0: i32) -> (i32, i32) {
    %c0_i32 = arith.constant 0 : i32
    %c0_i32_0 = arith.constant 0 : i32
    %c0_i32_1 = arith.constant 0 : i32
    return %c0_i32, %c0_i32_0 : i32, i32
  }
  func.func @transform_2(%arg0: i32) -> (i32, i32) {
    %c0_i32 = arith.constant 0 : i32
    %c0_i32_0 = arith.constant 0 : i32
    %c0_i32_1 = arith.constant 0 : i32
    return %c0_i32, %c0_i32_0 : i32, i32
  }
  func.func @transform_3(%arg0: i32) -> (i32, i32) {
    %c0_i32 = arith.constant 0 : i32
    %c0_i32_0 = arith.constant 0 : i32
    %c0_i32_1 = arith.constant 0 : i32
    return %c0_i32, %c0_i32_0 : i32, i32
  }
  func.func @transform_4(%arg0: i32) -> (i32, i32) {
    %c0_i32 = arith.constant 0 : i32
    %c0_i32_0 = arith.constant 0 : i32
    %c0_i32_1 = arith.constant 0 : i32
    return %c0_i32, %c0_i32_0 : i32, i32
  }
  func.func @transform_5(%arg0: i32) -> (i32, i32) {
    %c0_i32 = arith.constant 0 : i32
    %c0_i32_0 = arith.constant 0 : i32
    %c0_i32_1 = arith.constant 0 : i32
    return %c0_i32, %c0_i32_0 : i32, i32
  }
  func.func @transform_6(%arg0: i32) -> (i32, i32) {
    %c0_i32 = arith.constant 0 : i32
    %c0_i32_0 = arith.constant 0 : i32
    %c0_i32_1 = arith.constant 0 : i32
    return %c0_i32, %c0_i32_0 : i32, i32
  }
  func.func @transform_7(%arg0: i32) -> (i32, i32) {
    %c0_i32 = arith.constant 0 : i32
    %c0_i32_0 = arith.constant 0 : i32
    return %arg0, %c0_i32 : i32, i32
  }
}

module attributes {stable_mosaic.version = 11 : i64} {
  func.func @_linear_tiled_kernel(%arg0: i32, %arg1: i32, %arg2: i32, %arg3: memref<8x128xbf16, #tpu.memory_space<vmem>>, %arg4: memref<128x128xbf16, #tpu.memory_space<vmem>>, %arg5: memref<1x128xbf16, #tpu.memory_space<vmem>>, %arg6: memref<8x128xbf16, #tpu.memory_space<vmem>>, %arg7: memref<8x128xf32, #tpu.memory_space<vmem>>) attributes {dimension_semantics = [#tpu.dimension_semantics<parallel>, #tpu.dimension_semantics<parallel>, #tpu.dimension_semantics<arbitrary>], iteration_bounds = array<i64: 1, 1, 1>, scalar_prefetch = 0 : i64, scratch_operands = 1 : i64, tpu.core_type = #tpu.core_type<tc>, window_params = [{transform_indices = @transform_0, window_bounds = array<i64: 8, 128>}, {transform_indices = @transform_1, window_bounds = array<i64: 128, 128>}, {transform_indices = @transform_2, window_bounds = array<i64: 1, 128>}, {transform_indices = @transform_3, window_bounds = array<i64: 8, 128>}]} {
    %c0_i32 = arith.constant 0 : i32
    %0 = arith.cmpi eq, %arg2, %c0_i32 : i32
    %1 = arith.extui %0 : i1 to i32
    %c0_i32_0 = arith.constant 0 : i32
    %2 = arith.cmpi ne, %1, %c0_i32_0 : i32
    scf.if %2 {
      %c0_10 = arith.constant 0 : index
      %c0_11 = arith.constant 0 : index
      %12 = vector.load %arg5[%c0_10, %c0_11] : memref<1x128xbf16, #tpu.memory_space<vmem>>, vector<1x128xbf16>
      %13 = arith.extf %12 : vector<1x128xbf16> to vector<1x128xf32>
      %14 = vector.shape_cast %13 : vector<1x128xf32> to vector<1x128xf32>
      %15 = vector.broadcast %14 : vector<1x128xf32> to vector<8x128xf32>
      %c0_12 = arith.constant 0 : index
      %c0_13 = arith.constant 0 : index
      %16 = vector.load %arg7[%c0_12, %c0_13] : memref<8x128xf32, #tpu.memory_space<vmem>>, vector<8x128xf32>
      tpu.vector_store %arg7[%c0_12, %c0_13], %15 {strides = array<i32>} : memref<8x128xf32, #tpu.memory_space<vmem>>, vector<8x128xf32>,
    } else {
    }
    %c0 = arith.constant 0 : index
    %c0_1 = arith.constant 0 : index
    %3 = vector.load %arg7[%c0, %c0_1] : memref<8x128xf32, #tpu.memory_space<vmem>>, vector<8x128xf32>
    %c0_2 = arith.constant 0 : index
    %c0_3 = arith.constant 0 : index
    %4 = vector.load %arg3[%c0_2, %c0_3] : memref<8x128xbf16, #tpu.memory_space<vmem>>, vector<8x128xbf16>
    %c0_4 = arith.constant 0 : index
    %c0_5 = arith.constant 0 : index
    %5 = vector.load %arg4[%c0_4, %c0_5] : memref<128x128xbf16, #tpu.memory_space<vmem>>, vector<128x128xbf16>
    %cst = arith.constant dense<0.000000e+00> : vector<8x128xf32>
    %6 = tpu.matmul %4, %5, %cst {dimension_numbers = #tpu.dot_dimension_numbers<[1], [0], [0], [1], [0, 0, 1, 1], [], []>} : vector<8x128xbf16>, vector<128x128xbf16>, vector<8x128xf32> -> vector<8x128xf32>
    %7 = arith.addf %3, %6 : vector<8x128xf32>
    %c0_6 = arith.constant 0 : index
    %c0_7 = arith.constant 0 : index
    %8 = vector.load %arg7[%c0_6, %c0_7] : memref<8x128xf32, #tpu.memory_space<vmem>>, vector<8x128xf32>
    tpu.vector_store %arg7[%c0_6, %c0_7], %7 {strides = array<i32>} : memref<8x128xf32, #tpu.memory_space<vmem>>, vector<8x128xf32>,
    %c0_i32_8 = arith.constant 0 : i32
    %9 = arith.cmpi eq, %arg2, %c0_i32_8 : i32
    %10 = arith.extui %9 : i1 to i32
    %c0_i32_9 = arith.constant 0 : i32
    %11 = arith.cmpi ne, %10, %c0_i32_9 : i32
    scf.if %11 {
      %c0_10 = arith.constant 0 : index
      %c0_11 = arith.constant 0 : index
      %12 = vector.load %arg7[%c0_10, %c0_11] : memref<8x128xf32, #tpu.memory_space<vmem>>, vector<8x128xf32>
      %cst_12 = arith.constant 0.000000e+00 : f32
      %13 = vector.broadcast %cst_12 : f32 to vector<8x128xf32>
      %14 = arith.maximumf %12, %13 : vector<8x128xf32>
      %15 = arith.truncf %14 : vector<8x128xf32> to vector<8x128xbf16>
      %c0_13 = arith.constant 0 : index
      %c0_14 = arith.constant 0 : index
      %16 = vector.load %arg6[%c0_13, %c0_14] : memref<8x128xbf16, #tpu.memory_space<vmem>>, vector<8x128xbf16>
      tpu.vector_store %arg6[%c0_13, %c0_14], %15 {strides = array<i32>} : memref<8x128xbf16, #tpu.memory_space<vmem>>, vector<8x128xbf16>,
    } else {
    }
    return
  }
  func.func @transform_0(%arg0: i32, %arg1: i32, %arg2: i32) -> (i32, i32) {
    %c0_i32 = arith.constant 0 : i32
    return %arg0, %arg2 : i32, i32
  }
  func.func @transform_1(%arg0: i32, %arg1: i32, %arg2: i32) -> (i32, i32) {
    %c0_i32 = arith.constant 0 : i32
    return %arg2, %arg1 : i32, i32
  }
  func.func @transform_2(%arg0: i32, %arg1: i32, %arg2: i32) -> (i32, i32) {
    %c0_i32 = arith.constant 0 : i32
    %c0_i32_0 = arith.constant 0 : i32
    return %c0_i32, %arg1 : i32, i32
  }
  func.func @transform_3(%arg0: i32, %arg1: i32, %arg2: i32) -> (i32, i32) {
    %c0_i32 = arith.constant 0 : i32
    return %arg0, %arg1 : i32, i32
  }
}

</mosaic_0001>

<bundles_post_ra>
// kernel: tpu_custom_call.1
= control target key start
LH: loop header
LB: loop body
LE: loop exit
PB: predicated region body
PF: predicated region fallthrough
CT: control target
= control target key end

     0   :  { %12 = vsyncpa [#allocation3], 0  ;;  %s679_s0 = inlined_call_operand.hbm [shape: bf16[8,128], index: 0, kind: input, shape index: {}]   ;;  %s680_s1 = inlined_call_operand.hbm [shape: bf16[128,128], index: 1, kind: input, shape index: {}]   ;;  %s681_s2 = inlined_call_operand.vmem [shape: bf16[1,128], index: 2, kind: input, shape index: {}]   ;;  %s682_s3 = inlined_call_operand.hbm [shape: bf16[128,128], index: 3, kind: input, shape index: {}]   ;;  %s683_s4 = inlined_call_operand.vmem [shape: bf16[1,128], index: 4, kind: input, shape index: {}]   ;;  %s684_s5 = inlined_call_operand.hbm [shape: bf16[128,128], index: 5, kind: input, shape index: {}]   ;;  %s685_s6 = inlined_call_operand.vmem [shape: bf16[1,128], index: 6, kind: input, shape index: {}]   ;;  %s686_s7 = inlined_call_operand.hbm [shape: f32[8,128], index: 7, kind: output, shape index: {}]  }
   0x1   :  { %13 = vsyncpa [#allocation6], 0 }
   0x2   :  { %14 = vsyncpa [#allocation9], 0  ;;  %s31_s26 = sshll.u32 %s680_s1, 4  ;;  %s32_s26 = int_to_ptr.hbm [resolvable:$true] %s31_s26 }
   0x3   :  { %15 = vsyncpa [#allocation4], 0  ;;  %s608_s27 = smov [#allocation5]   ;;  %s21_s8 = sshll.u32 %s679_s0, 4  ;;  %s22_s8 = int_to_ptr.hbm [resolvable:$true] %s21_s8 }
   0x4   :  { %s33_s28 = sshll.u32 %s608_s27, 4  ;;  %s609_s9 = smov 64   ;;  %s34_s28 = int_to_ptr.vmem [resolvable:$true] %s33_s28 }
   0x5   :  { %s610_s10 = smov 4   ;;  %s611_s11 = smov [#allocation2]  }
   0x6   :  { %39 = dma.hbm_to_vmem [thread:$0]  %s32_s26, 1024, %s34_s28, [#allocation6], %s609_s9, %s609_s9, %s610_s10  }
   0x7   :  { %s23_s12 = sshll.u32 %s611_s11, 4  ;;  %s46_s15 = sshll.u32 %s682_s3, 4  ;;  %s24_s12 = int_to_ptr.vmem [resolvable:$true] %s23_s12  ;;  %s47_s15 = int_to_ptr.hbm [resolvable:$true] %s46_s15 }
   0x8   :  { %26 = dma.hbm_to_vmem [thread:$0]  %s22_s8, 64, %s24_s12, [#allocation3]  }
   0x9   :  { %s61_s17 = sshll.u32 %s684_s5, 4  ;;  %s612_s18 = smov [#allocation7]   ;;  %s62_s17 = int_to_ptr.hbm [resolvable:$true] %s61_s17 }
   0xa   :  { %s48_s19 = sshll.u32 %s612_s18, 4  ;;  %s613_s0 = smov [#allocation8]   ;;  %s49_s19 = int_to_ptr.vmem [resolvable:$true] %s48_s19 }
   0xb   :  { %54 = dma.hbm_to_vmem [thread:$0]  %s47_s15, 1024, %s49_s19, [#allocation6], %s609_s9, %s609_s9, %s610_s10  }
   0xc   :  { %s63_s20 = sshll.u32 %s613_s0, 4  ;;  %s64_s20 = int_to_ptr.vmem [resolvable:$true] %s63_s20 }
   0xd   :  { %69 = dma.hbm_to_vmem [thread:$0]  %s62_s17, 1024, %s64_s20, [#allocation9], %s609_s9, %s609_s9, %s610_s10  }
   0xe   :  { %600 = dma.done.wait [#allocation3], 64  }
   0xf   :  { %601 = vsyncadd [#allocation3], 4294967232 }
  0x10   :  { %602 = dma.done.wait [#allocation6], 2048  }
  0x11   :  { %603 = vsyncadd [#allocation6], 4294965248 }
  0x12   :  { %604 = dma.done.wait [#allocation9], 1024  }
  0x13   :  { %605 = vsyncadd [#allocation9], 4294966272  ;;  %v456_v0 = vld [vmem:[#allocation5 + $0x38] sm:$0xff]  ;;  %v455_v1 = vld [vmem:[#allocation5 + $0x30] sm:$0xff]  ;;  %s614_s24 = smov [#allocation10]  }
  0x14   :  { %156 = vmatpush.bf16.msra.mxu0 %v456_v0  ;;  %v464_v2 = vld [vmem:[#allocation7 + $0x38] sm:$0xff]  ;;  %v463_v3 = vld [vmem:[#allocation7 + $0x30] sm:$0xff]  ;;  %v454_v4 = vld [vmem:[#allocation5 + $0x28] sm:$0xff]  ;;  %s339_s25 = sshll.u32 %s614_s24, 4  ;;  %s340_s25 = int_to_ptr.vmem [resolvable:$true] %s339_s25 }
  0x15   :  { %238 = vmatpush.bf16.msra.mxu1 %v464_v2  ;;  %v462_v5 = vld [vmem:[#allocation7 + $0x28] sm:$0xff]  ;;  %v453_v6 = vld [vmem:[#allocation5 + $0x20] sm:$0xff]  ;;  %v452_v8 = vld [vmem:[#allocation5 + $0x18] sm:$0xff] }
  0x16   :  { %v461_v7 = vld [vmem:[#allocation7 + $0x20] sm:$0xff]  ;;  %v460_v9 = vld [vmem:[#allocation7 + $0x18] sm:$0xff]  ;;  %v451_v10 = vld [vmem:[#allocation5 + $0x10] sm:$0xff] }
  0x17   :  { %v459_v11 = vld [vmem:[#allocation7 + $0x10] sm:$0xff]  ;;  %v450_v12 = vld [vmem:[#allocation5 + $0x8] sm:$0xff]  ;;  %v449_v13 = vld [vmem:[#allocation5] sm:$0xff] }
  0x18   :  { %157 = vmatpush.bf16.msra.mxu0 %v455_v1  ;;  %v88_v14 = vld [vmem:[#allocation2] sm:$0xf]  ;;  %v458_v15 = vld [vmem:[#allocation7 + $0x8] sm:$0xff]  ;;  %v457_v16 = vld [vmem:[#allocation7] sm:$0xff] }
  0x19   :  { %239 = vmatpush.bf16.msra.mxu1 %v463_v3  ;;  %v472_v17 = vld [vmem:[#allocation8 + $0x38] sm:$0xff]  ;;  %v471_v18 = vld [vmem:[#allocation8 + $0x30] sm:$0xff]  ;;  %v470_v19 = vld [vmem:[#allocation8 + $0x28] sm:$0xff] }
  0x1a   :  { %320 = vmatpush.bf16.msra.mxu2 %v472_v17  ;;  %v469_v20 = vld [vmem:[#allocation8 + $0x20] sm:$0xff]  ;;  %v105_v21 = vld [vmem:[%s681_s2] sm:$0x1]  ;;  %v467_v24 = vld [vmem:[#allocation8 + $0x10] sm:$0xff] }
  0x1b   :  { %v468_v22 = vld [vmem:[#allocation8 + $0x18] sm:$0xff]  ;;  %v106_v23 = vunpack.c.l.bf16 %v105_v21  ;;  %v466_v31 = vld [vmem:[#allocation8 + $0x8] sm:$0xff]  ;;  %v465_v32 = vld [vmem:[#allocation8] sm:$0xff] }
  0x1c   :  { %158 = vmatpush.bf16.msra.mxu0 %v454_v4  ;;  %v187_v33 = vld [vmem:[%s683_s4] sm:$0x1]  ;;  %s341_s4 = sshll.u32 %s686_s7, 4  ;;  %s342_s4 = int_to_ptr.hbm [resolvable:$true] %s341_s4 }
  0x1d   :  { %240 = vmatpush.bf16.msra.mxu1 %v462_v5  ;;  %v107_v25 = vperm.slane %v106_v23, 0  ;;  %v188_v34 = vunpack.c.l.bf16 %v187_v33  ;;  %v269_v41 = vld [vmem:[%s685_s6] sm:$0x1] }
  0x1e   :  { %321 = vmatpush.bf16.msra.mxu2 %v471_v18  ;;  %v270_v42 = vunpack.c.l.bf16 %v269_v41 }
  0x1f   :  { %v189_v35 = vperm.slane %v188_v34, 0 }
  0x20   :  { %159 = vmatpush.bf16.msra.mxu0 %v453_v6  ;;  %v271_v43 = vperm.slane %v270_v42, 0 }
  0x21   :  { %241 = vmatpush.bf16.msra.mxu1 %v461_v7 }
  0x22   :  { %322 = vmatpush.bf16.msra.mxu2 %v470_v19 }
  0x24   :  { %160 = vmatpush.bf16.msra.mxu0 %v452_v8 }
  0x25   :  { %242 = vmatpush.bf16.msra.mxu1 %v460_v9 }
  0x26   :  { %323 = vmatpush.bf16.msra.mxu2 %v469_v20 }
  0x28   :  { %161 = vmatpush.bf16.msra.mxu0 %v451_v10 }
  0x29   :  { %243 = vmatpush.bf16.msra.mxu1 %v459_v11 }
  0x2a   :  { %324 = vmatpush.bf16.msra.mxu2 %v468_v22 }
  0x2c   :  { %162 = vmatpush.bf16.msra.mxu0 %v450_v12 }
  0x2d   :  { %244 = vmatpush.bf16.msra.mxu1 %v458_v15 }
  0x2e   :  { %325 = vmatpush.bf16.msra.mxu2 %v467_v24 }
  0x30   :  { %163 = vmatpush.bf16.msra.mxu0 %v449_v13 }
  0x31   :  { %245 = vmatpush.bf16.msra.mxu1 %v457_v16 }
  0x32   :  { %326 = vmatpush.bf16.msra.mxu2 %v466_v31 }
  0x33   :  { %164 = vmatmul.bf16.vlgmr.msra.gmra.mxu0 %v88_v14 }
  0x36   :  { %327 = vmatpush.bf16.msra.mxu2 %v465_v32 }
  0xb0   :  { %v165_v26 = vpop.f32.mrf.mxu0 }
  0xb1   :  { %v166_v27 = vadd.f32 %v165_v26, %v107_v25 }
  0xb3   :  { %v169_v28 = vmax.f32 %v166_v27, 0.0 }
  0xb5   :  { %v170_v29 = vpack.c.bf16 %v169_v28, %v169_v28 }
  0xb7   :  { %246 = vmatmul.bf16.vlgmr.msra.gmra.mxu1 %v170_v29 }
  0xb8   :  { %v167_v30 = vpop.f32.mrf.mxu0 }
 0x134   :  { %v247_v36 = vpop.f32.mrf.mxu1 }
 0x135   :  { %v248_v37 = vadd.f32 %v247_v36, %v189_v35 }
 0x137   :  { %v251_v38 = vmax.f32 %v248_v37, 0.0 }
 0x139   :  { %v252_v39 = vpack.c.bf16 %v251_v38, %v251_v38 }
 0x13b   :  { %328 = vmatmul.bf16.vlgmr.msra.gmra.mxu2 %v252_v39 }
 0x13c   :  { %v249_v40 = vpop.f32.mrf.mxu1 }
 0x1be   :  { %v329_v44 = vpop.f32.mrf.mxu2 }
 0x1bf   :  { %v330_v45 = vadd.f32 %v329_v44, %v271_v43 }
 0x1c1   :  { %333 = vst [vmem:[#allocation10] sm:$0xff] %v330_v45 }
 0x1c2   :  { %344 = dma.vmem_to_hbm [thread:$0]  %s340_s25, 128, %s342_s4, [#allocation4]  }
 0x1c6   :  { %v331_v46 = vpop.f32.mrf.mxu2 }
 0x1c7   :  { %606 = dma.done.wait [#allocation4], 128  }
 0x1c8   :  { %607 = vsyncadd [#allocation4], 4294967168 }
 0x1c9   :  { %349 = vsyncpa [#allocation3], 1 }
 0x1ca   :  { %350 = vsyncpa [#allocation6], 1 }
 0x1cb   :  { %351 = vsyncpa [#allocation9], 1 }
 0x1cc   :  { %352 = vsyncpa [#allocation4], 1 }

// kernel: tpu_custom_call.1
= control target key start
LH: loop header
LB: loop body
LE: loop exit
PB: predicated region body
PF: predicated region fallthrough
CT: control target
= control target key end

     0   :  { %12 = vsyncpa [#allocation3], 0  ;;  %s679_s0 = inlined_call_operand.hbm [shape: bf16[8,128], index: 0, kind: input, shape index: {}]   ;;  %s680_s1 = inlined_call_operand.hbm [shape: bf16[128,128], index: 1, kind: input, shape index: {}]   ;;  %s681_s2 = inlined_call_operand.vmem [shape: bf16[1,128], index: 2, kind: input, shape index: {}]   ;;  %s682_s3 = inlined_call_operand.hbm [shape: bf16[128,128], index: 3, kind: input, shape index: {}]   ;;  %s683_s4 = inlined_call_operand.vmem [shape: bf16[1,128], index: 4, kind: input, shape index: {}]   ;;  %s684_s5 = inlined_call_operand.hbm [shape: bf16[128,128], index: 5, kind: input, shape index: {}]   ;;  %s685_s6 = inlined_call_operand.vmem [shape: bf16[1,128], index: 6, kind: input, shape index: {}]   ;;  %s686_s7 = inlined_call_operand.hbm [shape: f32[8,128], index: 7, kind: output, shape index: {}]  }
   0x1   :  { %13 = vsyncpa [#allocation6], 0 }
   0x2   :  { %14 = vsyncpa [#allocation9], 0  ;;  %s31_s26 = sshll.u32 %s680_s1, 4  ;;  %s32_s26 = int_to_ptr.hbm [resolvable:$true] %s31_s26 }
   0x3   :  { %15 = vsyncpa [#allocation4], 0  ;;  %s608_s27 = smov [#allocation5]   ;;  %s21_s8 = sshll.u32 %s679_s0, 4  ;;  %s22_s8 = int_to_ptr.hbm [resolvable:$true] %s21_s8 }
   0x4   :  { %s33_s28 = sshll.u32 %s608_s27, 4  ;;  %s609_s9 = smov 64   ;;  %s34_s28 = int_to_ptr.vmem [resolvable:$true] %s33_s28 }
   0x5   :  { %s610_s10 = smov 4   ;;  %s611_s11 = smov [#allocation2]  }
   0x6   :  { %39 = dma.hbm_to_vmem [thread:$0]  %s32_s26, 1024, %s34_s28, [#allocation6], %s609_s9, %s609_s9, %s610_s10  }
   0x7   :  { %s23_s12 = sshll.u32 %s611_s11, 4  ;;  %s46_s15 = sshll.u32 %s682_s3, 4  ;;  %s24_s12 = int_to_ptr.vmem [resolvable:$true] %s23_s12  ;;  %s47_s15 = int_to_ptr.hbm [resolvable:$true] %s46_s15 }
   0x8   :  { %26 = dma.hbm_to_vmem [thread:$0]  %s22_s8, 64, %s24_s12, [#allocation3]  }
   0x9   :  { %s61_s17 = sshll.u32 %s684_s5, 4  ;;  %s612_s18 = smov [#allocation7]   ;;  %s62_s17 = int_to_ptr.hbm [resolvable:$true] %s61_s17 }
   0xa   :  { %s48_s19 = sshll.u32 %s612_s18, 4  ;;  %s613_s0 = smov [#allocation8]   ;;  %s49_s19 = int_to_ptr.vmem [resolvable:$true] %s48_s19 }
   0xb   :  { %54 = dma.hbm_to_vmem [thread:$0]  %s47_s15, 1024, %s49_s19, [#allocation6], %s609_s9, %s609_s9, %s610_s10  }
   0xc   :  { %s63_s20 = sshll.u32 %s613_s0, 4  ;;  %s64_s20 = int_to_ptr.vmem [resolvable:$true] %s63_s20 }
   0xd   :  { %69 = dma.hbm_to_vmem [thread:$0]  %s62_s17, 1024, %s64_s20, [#allocation9], %s609_s9, %s609_s9, %s610_s10  }
   0xe   :  { %600 = dma.done.wait [#allocation3], 64  }
   0xf   :  { %601 = vsyncadd [#allocation3], 4294967232 }
  0x10   :  { %602 = dma.done.wait [#allocation6], 2048  }
  0x11   :  { %603 = vsyncadd [#allocation6], 4294965248 }
  0x12   :  { %604 = dma.done.wait [#allocation9], 1024  }
  0x13   :  { %605 = vsyncadd [#allocation9], 4294966272  ;;  %v456_v0 = vld [vmem:[#allocation5 + $0x38] sm:$0xff]  ;;  %v455_v1 = vld [vmem:[#allocation5 + $0x30] sm:$0xff]  ;;  %s614_s24 = smov [#allocation10]  }
  0x14   :  { %156 = vmatpush.bf16.msra.mxu0 %v456_v0  ;;  %v464_v2 = vld [vmem:[#allocation7 + $0x38] sm:$0xff]  ;;  %v463_v3 = vld [vmem:[#allocation7 + $0x30] sm:$0xff]  ;;  %v454_v4 = vld [vmem:[#allocation5 + $0x28] sm:$0xff]  ;;  %s339_s25 = sshll.u32 %s614_s24, 4  ;;  %s340_s25 = int_to_ptr.vmem [resolvable:$true] %s339_s25 }
  0x15   :  { %238 = vmatpush.bf16.msra.mxu1 %v464_v2  ;;  %v462_v5 = vld [vmem:[#allocation7 + $0x28] sm:$0xff]  ;;  %v453_v6 = vld [vmem:[#allocation5 + $0x20] sm:$0xff]  ;;  %v452_v8 = vld [vmem:[#allocation5 + $0x18] sm:$0xff] }
  0x16   :  { %v461_v7 = vld [vmem:[#allocation7 + $0x20] sm:$0xff]  ;;  %v460_v9 = vld [vmem:[#allocation7 + $0x18] sm:$0xff]  ;;  %v451_v10 = vld [vmem:[#allocation5 + $0x10] sm:$0xff] }
  0x17   :  { %v459_v11 = vld [vmem:[#allocation7 + $0x10] sm:$0xff]  ;;  %v450_v12 = vld [vmem:[#allocation5 + $0x8] sm:$0xff]  ;;  %v449_v13 = vld [vmem:[#allocation5] sm:$0xff] }
  0x18   :  { %157 = vmatpush.bf16.msra.mxu0 %v455_v1  ;;  %v88_v14 = vld [vmem:[#allocation2] sm:$0xf]  ;;  %v458_v15 = vld [vmem:[#allocation7 + $0x8] sm:$0xff]  ;;  %v457_v16 = vld [vmem:[#allocation7] sm:$0xff] }
  0x19   :  { %239 = vmatpush.bf16.msra.mxu1 %v463_v3  ;;  %v472_v17 = vld [vmem:[#allocation8 + $0x38] sm:$0xff]  ;;  %v471_v18 = vld [vmem:[#allocation8 + $0x30] sm:$0xff]  ;;  %v470_v19 = vld [vmem:[#allocation8 + $0x28] sm:$0xff] }
  0x1a   :  { %320 = vmatpush.bf16.msra.mxu2 %v472_v17  ;;  %v469_v20 = vld [vmem:[#allocation8 + $0x20] sm:$0xff]  ;;  %v105_v21 = vld [vmem:[%s681_s2] sm:$0x1]  ;;  %v467_v24 = vld [vmem:[#allocation8 + $0x10] sm:$0xff] }
  0x1b   :  { %v468_v22 = vld [vmem:[#allocation8 + $0x18] sm:$0xff]  ;;  %v106_v23 = vunpack.c.l.bf16 %v105_v21  ;;  %v466_v31 = vld [vmem:[#allocation8 + $0x8] sm:$0xff]  ;;  %v465_v32 = vld [vmem:[#allocation8] sm:$0xff] }
  0x1c   :  { %158 = vmatpush.bf16.msra.mxu0 %v454_v4  ;;  %v187_v33 = vld [vmem:[%s683_s4] sm:$0x1]  ;;  %s341_s4 = sshll.u32 %s686_s7, 4  ;;  %s342_s4 = int_to_ptr.hbm [resolvable:$true] %s341_s4 }
  0x1d   :  { %240 = vmatpush.bf16.msra.mxu1 %v462_v5  ;;  %v107_v25 = vperm.slane %v106_v23, 0  ;;  %v188_v34 = vunpack.c.l.bf16 %v187_v33  ;;  %v269_v41 = vld [vmem:[%s685_s6] sm:$0x1] }
  0x1e   :  { %321 = vmatpush.bf16.msra.mxu2 %v471_v18  ;;  %v270_v42 = vunpack.c.l.bf16 %v269_v41 }
  0x1f   :  { %v189_v35 = vperm.slane %v188_v34, 0 }
  0x20   :  { %159 = vmatpush.bf16.msra.mxu0 %v453_v6  ;;  %v271_v43 = vperm.slane %v270_v42, 0 }
  0x21   :  { %241 = vmatpush.bf16.msra.mxu1 %v461_v7 }
  0x22   :  { %322 = vmatpush.bf16.msra.mxu2 %v470_v19 }
  0x24   :  { %160 = vmatpush.bf16.msra.mxu0 %v452_v8 }
  0x25   :  { %242 = vmatpush.bf16.msra.mxu1 %v460_v9 }
  0x26   :  { %323 = vmatpush.bf16.msra.mxu2 %v469_v20 }
  0x28   :  { %161 = vmatpush.bf16.msra.mxu0 %v451_v10 }
  0x29   :  { %243 = vmatpush.bf16.msra.mxu1 %v459_v11 }
  0x2a   :  { %324 = vmatpush.bf16.msra.mxu2 %v468_v22 }
  0x2c   :  { %162 = vmatpush.bf16.msra.mxu0 %v450_v12 }
  0x2d   :  { %244 = vmatpush.bf16.msra.mxu1 %v458_v15 }
  0x2e   :  { %325 = vmatpush.bf16.msra.mxu2 %v467_v24 }
  0x30   :  { %163 = vmatpush.bf16.msra.mxu0 %v449_v13 }
  0x31   :  { %245 = vmatpush.bf16.msra.mxu1 %v457_v16 }
  0x32   :  { %326 = vmatpush.bf16.msra.mxu2 %v466_v31 }
  0x33   :  { %164 = vmatmul.bf16.vlgmr.msra.gmra.mxu0 %v88_v14 }
  0x36   :  { %327 = vmatpush.bf16.msra.mxu2 %v465_v32 }
  0xb0   :  { %v165_v26 = vpop.f32.mrf.mxu0 }
  0xb1   :  { %v166_v27 = vadd.f32 %v165_v26, %v107_v25 }
  0xb3   :  { %v169_v28 = vmax.f32 %v166_v27, 0.0 }
  0xb5   :  { %v170_v29 = vpack.c.bf16 %v169_v28, %v169_v28 }
  0xb7   :  { %246 = vmatmul.bf16.vlgmr.msra.gmra.mxu1 %v170_v29 }
  0xb8   :  { %v167_v30 = vpop.f32.mrf.mxu0 }
 0x134   :  { %v247_v36 = vpop.f32.mrf.mxu1 }
 0x135   :  { %v248_v37 = vadd.f32 %v247_v36, %v189_v35 }
 0x137   :  { %v251_v38 = vmax.f32 %v248_v37, 0.0 }
 0x139   :  { %v252_v39 = vpack.c.bf16 %v251_v38, %v251_v38 }
 0x13b   :  { %328 = vmatmul.bf16.vlgmr.msra.gmra.mxu2 %v252_v39 }
 0x13c   :  { %v249_v40 = vpop.f32.mrf.mxu1 }
 0x1be   :  { %v329_v44 = vpop.f32.mrf.mxu2 }
 0x1bf   :  { %v330_v45 = vadd.f32 %v329_v44, %v271_v43 }
 0x1c1   :  { %333 = vst [vmem:[#allocation10] sm:$0xff] %v330_v45 }
 0x1c2   :  { %344 = dma.vmem_to_hbm [thread:$0]  %s340_s25, 128, %s342_s4, [#allocation4]  }
 0x1c6   :  { %v331_v46 = vpop.f32.mrf.mxu2 }
 0x1c7   :  { %606 = dma.done.wait [#allocation4], 128  }
 0x1c8   :  { %607 = vsyncadd [#allocation4], 4294967168 }
 0x1c9   :  { %349 = vsyncpa [#allocation3], 1 }
 0x1ca   :  { %350 = vsyncpa [#allocation6], 1 }
 0x1cb   :  { %351 = vsyncpa [#allocation9], 1 }
 0x1cc   :  { %352 = vsyncpa [#allocation4], 1 }

// kernel: tpu_custom_call.1
= control target key start
LH: loop header
LB: loop body
LE: loop exit
PB: predicated region body
PF: predicated region fallthrough
CT: control target
= control target key end

     0   :  { %8 = vsyncpa [#allocation4], 0  ;;  %s319_s0 = inlined_call_operand.hbm [shape: bf16[8,128], index: 0, kind: input, shape index: {}]   ;;  %s320_s1 = inlined_call_operand.hbm [shape: bf16[128,128], index: 1, kind: input, shape index: {}]   ;;  %s321_s2 = inlined_call_operand.vmem [shape: bf16[1,128], index: 2, kind: input, shape index: {}]   ;;  %s322_s3 = inlined_call_operand.hbm [shape: bf16[8,128], index: 3, kind: output, shape index: {}]  }
   0x1   :  { %9 = vsyncpa [#allocation7], 0 }
   0x2   :  { %10 = vsyncpa [#allocation5], 0  ;;  %s16_s14 = sshll.u32 %s319_s0, 4  ;;  %s282_s15 = smov [#allocation3]   ;;  %s17_s14 = int_to_ptr.hbm [resolvable:$true] %s16_s14 }
   0x3   :  { %s18_s16 = sshll.u32 %s282_s15, 4  ;;  %s26_s19 = sshll.u32 %s320_s1, 4  ;;  %s19_s16 = int_to_ptr.vmem [resolvable:$true] %s18_s16  ;;  %s27_s19 = int_to_ptr.hbm [resolvable:$true] %s26_s19 }
   0x4   :  { %21 = dma.hbm_to_vmem [thread:$0]  %s17_s14, 64, %s19_s16, [#allocation4]  }
   0x5   :  { %s283_s20 = smov [#allocation6]   ;;  %s284_s22 = smov 64  }
   0x6   :  { %s28_s21 = sshll.u32 %s283_s20, 4  ;;  %s285_s23 = smov 4   ;;  %s29_s21 = int_to_ptr.vmem [resolvable:$true] %s28_s21 }
   0x7   :  { %34 = dma.hbm_to_vmem [thread:$0]  %s27_s19, 1024, %s29_s21, [#allocation7], %s284_s22, %s284_s22, %s285_s23  }
   0x8   :  { %276 = dma.done.wait [#allocation4], 64  }
   0x9   :  { %277 = vsyncadd [#allocation4], 4294967232 }
   0xa   :  { %278 = dma.done.wait [#allocation7], 1024  }
   0xb   :  { %279 = vsyncadd [#allocation7], 4294966272  ;;  %v198_v0 = vld [vmem:[#allocation6 + $0x38] sm:$0xff]  ;;  %v197_v1 = vld [vmem:[#allocation6 + $0x30] sm:$0xff]  ;;  %s286_s24 = smov [#allocation8]   ;;  %s148_s28 = sshll.u32 %s322_s3, 4  ;;  %s149_s28 = int_to_ptr.hbm [resolvable:$true] %s148_s28 }
   0xc   :  { %119 = vmatpush.bf16.msra.mxu0 %v198_v0  ;;  %v196_v2 = vld [vmem:[#allocation6 + $0x28] sm:$0xff]  ;;  %v195_v3 = vld [vmem:[#allocation6 + $0x20] sm:$0xff]  ;;  %v194_v4 = vld [vmem:[#allocation6 + $0x18] sm:$0xff]  ;;  %s146_s25 = sshll.u32 %s286_s24, 4  ;;  %s147_s25 = int_to_ptr.vmem [resolvable:$true] %s146_s25 }
   0xd   :  { %v193_v5 = vld [vmem:[#allocation6 + $0x10] sm:$0xff]  ;;  %v192_v6 = vld [vmem:[#allocation6 + $0x8] sm:$0xff]  ;;  %v191_v7 = vld [vmem:[#allocation6] sm:$0xff] }
   0xe   :  { %v54_v8 = vld [vmem:[#allocation3] sm:$0xf] }
   0xf   :  { %v49_v9 = vld [vmem:[%s321_s2] sm:$0x1] }
  0x10   :  { %120 = vmatpush.bf16.msra.mxu0 %v197_v1  ;;  %v50_v10 = vunpack.c.l.bf16 %v49_v9 }
  0x12   :  { %v51_v11 = vperm.slane %v50_v10, 0 }
  0x14   :  { %121 = vmatpush.bf16.msra.mxu0 %v196_v2 }
  0x18   :  { %122 = vmatpush.bf16.msra.mxu0 %v195_v3 }
  0x1c   :  { %123 = vmatpush.bf16.msra.mxu0 %v194_v4 }
  0x20   :  { %124 = vmatpush.bf16.msra.mxu0 %v193_v5 }
  0x24   :  { %125 = vmatpush.bf16.msra.mxu0 %v192_v6 }
  0x28   :  { %126 = vmatpush.bf16.msra.mxu0 %v191_v7 }
  0x2b   :  { %127 = vmatmul.bf16.vlgmr.msra.gmra.mxu0 %v54_v8 }
  0xa8   :  { %v128_v12 = vpop.f32.mrf.mxu0 }
  0xa9   :  { %v132_v13 = vadd.f32 %v128_v12, %v51_v11 }
  0xab   :  { %v138_v14 = vmax.f32 %v132_v13, 0.0 }
  0xad   :  { %v139_v15 = vpack.c.bf16 %v138_v14, %v138_v14 }
  0xaf   :  { %140 = vst [vmem:[#allocation8] sm:$0xf] %v139_v15 }
  0xb0   :  { %v130_v16 = vpop.f32.mrf.mxu0  ;;  %151 = dma.vmem_to_hbm [thread:$0]  %s147_s25, 64, %s149_s28, [#allocation5]  }
  0xb1   :  { %280 = dma.done.wait [#allocation5], 64  }
  0xb2   :  { %281 = vsyncadd [#allocation5], 4294967232 }
  0xb3   :  { %156 = vsyncpa [#allocation4], 1 }
  0xb4   :  { %157 = vsyncpa [#allocation7], 1 }
  0xb5   :  { %158 = vsyncpa [#allocation5], 1 }

</bundles_post_ra>
